<compile_context>
chip_gen: v7x
topology: tpu7x:2x2x1
jax: 0.10.0
libtpu: 0.0.40
codegen_flags: <defaults>
</compile_context>

<pallas_src>
import jax
import jax.numpy as jnp
from jax.experimental import pallas as pl
from jax.experimental.pallas import tpu as pltpu


# ----------------------------------------------------------------------------
# Model configuration (deterministic synthetic shapes, mirroring the module)
# ----------------------------------------------------------------------------
BATCH = 2
V_FULL = 36          # vertices of the full FLAME part before cropping
V_CROP = 24          # vertices kept by the (synthetic) cropper
SPIRAL_K = 9         # spiral neighbourhood length per vertex
CHANNELS = [3, 16, 32]      # mesh-conv channel progression
DS_FACTORS = [2, 2]         # vertex downsampling factors per conv stage
MAIN_OUT = 64               # MeshConvEncoder.out_channels (latent dim)
PROJ_OUT = 32               # config.out_channels (final MLP projection)
PROJ_PAD = 128              # lane-dense padded width of the final output store

C0, C1, C2 = CHANNELS
V1 = -(-V_CROP // DS_FACTORS[0])    # 12 vertices after first downsample
V2 = -(-V1 // DS_FACTORS[1])        # 6 vertices after second downsample

K0_RAW = V_FULL * C0                # 108 raw input features per batch element
K0_PAD = 128                        # lane-aligned padded input width
H1 = V_CROP * C1                    # 384: layer-1 folded output width
H2 = V2 * C2                        # 192: layer-2 folded output width (== flatten dim)


# ----------------------------------------------------------------------------
# Parameter init (same parameterization as the reference module)
# ----------------------------------------------------------------------------
def _spiral_indices(num_verts, k):
    # deterministic synthetic spirals: ring neighbourhood (v, v+1, ..., v+k-1)
    v = jnp.arange(num_verts)[:, None]
    return (v + jnp.arange(k)[None, :]) % num_verts   # (V, K) int32


def init_params(key):
    params = {}
    params["crop_idx"] = jnp.arange(V_CROP, dtype=jnp.int32)   # synthetic crop

    conv_layers = []
    v = V_CROP
    for cin, cout, ds in zip(CHANNELS[:-1], CHANNELS[1:], DS_FACTORS):
        key, kw, kb = jax.random.split(key, 3)
        conv_layers.append(
            dict(
                spiral=_spiral_indices(v, SPIRAL_K),
                w=0.02 * jax.random.normal(kw, (SPIRAL_K * cin, cout), jnp.float32),
                b=0.02 * jax.random.normal(kb, (cout,), jnp.float32),
                ds=ds,
            )
        )
        v = (v + ds - 1) // ds
    params["conv_layers"] = conv_layers

    key, kw, kb = jax.random.split(key, 3)
    params["latent_w"] = 0.02 * jax.random.normal(kw, (H2, MAIN_OUT), jnp.float32)
    params["latent_b"] = 0.02 * jax.random.normal(kb, (MAIN_OUT,), jnp.float32)

    key, kw, kb = jax.random.split(key, 3)
    params["proj_w"] = 0.02 * jax.random.normal(kw, (MAIN_OUT, PROJ_OUT), jnp.float32)
    params["proj_b"] = 0.02 * jax.random.normal(kb, (PROJ_OUT,), jnp.float32)
    return params


# ----------------------------------------------------------------------------
# Fold crop + spiral gathers + per-tap linears + downsamples into dense
# per-layer weight matrices (wrapper, once at init time).
# ----------------------------------------------------------------------------
def _one_hot(idx, depth):
    return (idx[..., None] == jnp.arange(depth)).astype(jnp.float32)


def pack_for_kernel(params):
    l1, l2 = params["conv_layers"]

    # ---- layer 1: crop + spiral gather + linear folded into one dense matmul.
    #   out1[v, d] = sum_k sum_c x_full[crop_idx[spiral1[v,k]], c] * w1[k*C0+c, d]
    sel1 = _one_hot(params["crop_idx"][l1["spiral"]], V_FULL)        # (V_CROP, K, V_FULL)
    w1 = l1["w"].reshape(SPIRAL_K, C0, C1)
    wf1 = jnp.einsum("vku,kcd->ucvd", sel1, w1).reshape(K0_RAW, H1)
    # pad contraction dim 108 -> 128 (matches the lane-aligned x block; zero
    # rows are exact no-ops)
    wf1 = jnp.zeros((K0_PAD, H1), jnp.float32).at[:K0_RAW, :].set(wf1)
    bf1 = jnp.tile(l1["b"], V_CROP).reshape(1, H1)

    # ---- layer 2: fold BOTH vertex downsamples + spiral gather + linear.
    #   layer-1 output is kept at all V_CROP vertices; downsample 1 and
    #   downsample 2 become row selections composed into the gather:
    #   out2[r, d] = sum_k sum_c h1[ds1 * spiral2[ds2*r, k], c] * w2[k*C1+c, d]
    kept = jnp.arange(0, V1, l2["ds"])                               # rows kept by ds2
    fold_idx = DS_FACTORS[0] * l2["spiral"][kept, :]                 # (V2, K) into V_CROP
    assert int(jnp.max(fold_idx)) < V_CROP, "folded spiral index out of range"
    sel2 = _one_hot(fold_idx, V_CROP)                                # (V2, K, V_CROP)
    w2 = l2["w"].reshape(SPIRAL_K, C1, C2)
    wf2 = jnp.einsum("rku,kcd->ucrd", sel2, w2).reshape(H1, H2)
    bf2 = jnp.tile(l2["b"], V2).reshape(1, H2)

    # ---- latent: layer-2 folded output is already flattened in row-major
    # (vertex, channel) order, so latent_w is used as-is.
    wlat = params["latent_w"]                                        # (H2, MAIN_OUT)
    blat = params["latent_b"].reshape(1, MAIN_OUT)

    # ---- proj: lane-pad output channels 32 -> 128 so the final HBM store is
    # an unmasked full-lane vst; wrapper slices the first PROJ_OUT lanes out.
    wproj = jnp.zeros((MAIN_OUT, PROJ_PAD), jnp.float32).at[:, :PROJ_OUT].set(params["proj_w"])
    bproj = jnp.zeros((1, PROJ_PAD), jnp.float32).at[:, :PROJ_OUT].set(params["proj_b"][None, :])

    return (wf1, bf1, wf2, bf2, wlat, blat, wproj, bproj)


# ----------------------------------------------------------------------------
# The single fused Pallas kernel: whole forward = 4 matmuls + bias + lrelu
# ----------------------------------------------------------------------------
def _fused_encoder_kernel(
    x_ref,      # (TM, K0_PAD)        flattened + padded vertex offsets (batch on rows)
    w1_ref,     # (K0_PAD, H1)        crop + spiral conv 1, folded
    b1_ref,     # (1, H1)
    w2_ref,     # (H1, H2)            spiral conv 2 with both downsamples folded
    b2_ref,     # (1, H2)
    wlat_ref,   # (H2, MAIN_OUT)      latent linear
    blat_ref,   # (1, MAIN_OUT)
    wproj_ref,  # (MAIN_OUT, PROJ_PAD) proj MLP, lane-padded
    bproj_ref,  # (1, PROJ_PAD)
    o_ref,      # (TM, PROJ_PAD)      lane-dense output slab
):
    f32 = jnp.float32

    def lrelu(v):
        return jnp.where(v >= 0.0, v, 0.2 * v)

    h1 = lrelu(jnp.dot(x_ref[...], w1_ref[...], preferred_element_type=f32) + b1_ref[...])
    h2 = lrelu(jnp.dot(h1, w2_ref[...], preferred_element_type=f32) + b2_ref[...])
    z = lrelu(jnp.dot(h2, wlat_ref[...], preferred_element_type=f32) + blat_ref[...])
    y = lrelu(jnp.dot(z, wproj_ref[...], preferred_element_type=f32) + bproj_ref[...])
    o_ref[...] = y.astype(o_ref.dtype)


def fused_forward(packed, x):
    """x: (B, V_FULL, 3) f32 -> (B, PROJ_OUT) f32, one pallas_call."""
    assert x.ndim == 3 and x.shape[1:] == (V_FULL, C0)
    B = x.shape[0]

    # flatten (vertex, channel) onto lanes, pad to a lane-aligned width and a
    # sublane-aligned batch tile; for tiny B this is a single grid step.
    TM = min(256, max(8, -(-B // 8) * 8))
    nb = pl.cdiv(B, TM)
    B_pad = nb * TM

    x2d = x.reshape(B, K0_RAW)
    xp = jnp.zeros((B_pad, K0_PAD), x2d.dtype).at[:B, :K0_RAW].set(x2d)

    in_specs = [pl.BlockSpec((TM, K0_PAD), lambda i: (i, 0))]
    for a in packed:
        # weights/biases: constant index_map -> DMA'd once, VMEM-resident
        in_specs.append(pl.BlockSpec(a.shape, lambda i: (0, 0)))

    out_specs = pl.BlockSpec((TM, PROJ_PAD), lambda i: (i, 0))
    out_shape = jax.ShapeDtypeStruct((B_pad, PROJ_PAD), jnp.float32)

    flops = 2 * B_pad * (K0_PAD * H1 + H1 * H2 + H2 * MAIN_OUT + MAIN_OUT * PROJ_PAD)
    bytes_accessed = (
        B_pad * K0_PAD * 4                              # input (once)
        + sum(int(a.size) * 4 for a in packed)          # weights (resident, once)
        + B_pad * PROJ_PAD * 4                          # output
    )

    out = pl.pallas_call(
        _fused_encoder_kernel,
        out_shape=out_shape,
        grid=(nb,),
        in_specs=in_specs,
        out_specs=out_specs,
        compiler_params=pltpu.CompilerParams(
            # only shard across TensorCores when there are multiple batch tiles;
            # for B=2 (one grid step) sharding would just duplicate weight DMA.
            dimension_semantics=("parallel",) if nb > 1 else ("arbitrary",),
        ),
        cost_estimate=pl.CostEstimate(
            flops=flops,
            transcendentals=0,
            bytes_accessed=bytes_accessed,
        ),
    )(xp, *packed)

    return out[:B, :PROJ_OUT]


fused_forward_jit = jax.jit(fused_forward)


# ----------------------------------------------------------------------------
# Pure-JAX reference (mirrors the original module forward, for validation)
# ----------------------------------------------------------------------------
def reference_forward(params, x):
    def lrelu(v):
        return jnp.where(v >= 0.0, v, 0.2 * v)

    x = jnp.take(x, params["crop_idx"], axis=1)                    # crop
    for layer in params["conv_layers"]:
        B, V, Cin = x.shape
        gathered = jnp.take(x, layer["spiral"], axis=1)            # (B,V,K,Cin)
        flat = gathered.reshape(B * V, SPIRAL_K * Cin)
        out = lrelu(flat @ layer["w"] + layer["b"])
        x = out.reshape(B, V, layer["w"].shape[1])
        x = x[:, :: layer["ds"], :]                                # downsample
    B = x.shape[0]
    x = x.reshape(B, -1)
    x = lrelu(x @ params["latent_w"] + params["latent_b"])         # latent
    x = lrelu(x @ params["proj_w"] + params["proj_b"])             # proj MLP
    return x


if __name__ == "__main__":
    key = jax.random.PRNGKey(0)
    key, kparam, kx = jax.random.split(key, 3)
    params = init_params(kparam)
    packed = pack_for_kernel(params)

    x = jax.random.normal(kx, (BATCH, V_FULL, C0), dtype=jnp.float32)

    out = fused_forward_jit(packed, x)
    out = jax.block_until_ready(out)
    assert out.shape == (BATCH, PROJ_OUT), out.shape

    ref = jax.block_until_ready(reference_forward(params, x))
    max_err = float(jnp.max(jnp.abs(out - ref)))
    # default-precision f32 MXU matmuls may take multi-pass bf16 paths, so the
    # tolerance is slightly looser than strict f32 round-off.
    assert max_err < 1e-3, f"mismatch vs pure-JAX reference: {max_err}"

    print("KERNEL_OK")
</pallas_src>

<mosaic_0001>
module attributes {stable_mosaic.version = 11 : i64} {
  func.func @_fused_encoder_kernel(%arg0: i32, %arg1: memref<8x128xf32, #tpu.memory_space<vmem>>, %arg2: memref<128x384xf32, #tpu.memory_space<vmem>>, %arg3: memref<1x384xf32, #tpu.memory_space<vmem>>, %arg4: memref<384x192xf32, #tpu.memory_space<vmem>>, %arg5: memref<1x192xf32, #tpu.memory_space<vmem>>, %arg6: memref<192x64xf32, #tpu.memory_space<vmem>>, %arg7: memref<1x64xf32, #tpu.memory_space<vmem>>, %arg8: memref<64x128xf32, #tpu.memory_space<vmem>>, %arg9: memref<1x128xf32, #tpu.memory_space<vmem>>, %arg10: memref<8x128xf32, #tpu.memory_space<vmem>>) attributes {dimension_semantics = [#tpu.dimension_semantics<arbitrary>], iteration_bounds = array<i64: 1>, scalar_prefetch = 0 : i64, scratch_operands = 0 : i64, tpu.core_type = #tpu.core_type<tc>, window_params = [{transform_indices = @transform_0, window_bounds = array<i64: 8, 128>}, {pipeline_mode = #tpu.pipeline_mode<synchronous>, transform_indices = @transform_1, window_bounds = array<i64: 128, 384>}, {pipeline_mode = #tpu.pipeline_mode<synchronous>, transform_indices = @transform_2, window_bounds = array<i64: 1, 384>}, {pipeline_mode = #tpu.pipeline_mode<synchronous>, transform_indices = @transform_3, window_bounds = array<i64: 384, 192>}, {pipeline_mode = #tpu.pipeline_mode<synchronous>, transform_indices = @transform_4, window_bounds = array<i64: 1, 192>}, {pipeline_mode = #tpu.pipeline_mode<synchronous>, transform_indices = @transform_5, window_bounds = array<i64: 192, 64>}, {pipeline_mode = #tpu.pipeline_mode<synchronous>, transform_indices = @transform_6, window_bounds = array<i64: 1, 64>}, {pipeline_mode = #tpu.pipeline_mode<synchronous>, transform_indices = @transform_7, window_bounds = array<i64: 64, 128>}, {pipeline_mode = #tpu.pipeline_mode<synchronous>, transform_indices = @transform_8, window_bounds = array<i64: 1, 128>}, {transform_indices = @transform_9, window_bounds = array<i64: 8, 128>}]} {
    %c0 = arith.constant 0 : index
    %c0_0 = arith.constant 0 : index
    %0 = vector.load %arg1[%c0, %c0_0] : memref<8x128xf32, #tpu.memory_space<vmem>>, vector<8x128xf32>
    %c0_1 = arith.constant 0 : index
    %c0_2 = arith.constant 0 : index
    %1 = vector.load %arg2[%c0_1, %c0_2] : memref<128x384xf32, #tpu.memory_space<vmem>>, vector<128x384xf32>
    %cst = arith.constant dense<0.000000e+00> : vector<8x384xf32>
    %2 = tpu.matmul %0, %1, %cst {dimension_numbers = #tpu.dot_dimension_numbers<[1], [0], [0], [1], [0, 0, 1, 1], [], []>} : vector<8x128xf32>, vector<128x384xf32>, vector<8x384xf32> -> vector<8x384xf32>
    %c0_3 = arith.constant 0 : index
    %c0_4 = arith.constant 0 : index
    %3 = vector.load %arg3[%c0_3, %c0_4] : memref<1x384xf32, #tpu.memory_space<vmem>>, vector<1x384xf32>
    %4 = vector.broadcast %3 : vector<1x384xf32> to vector<8x384xf32>
    %5 = arith.addf %2, %4 : vector<8x384xf32>
    %cst_5 = arith.constant 0.000000e+00 : f32
    %6 = vector.broadcast %cst_5 : f32 to vector<8x384xf32>
    %7 = arith.cmpf oge, %5, %6 : vector<8x384xf32>
    %cst_6 = arith.constant 2.000000e-01 : f32
    %8 = vector.broadcast %cst_6 : f32 to vector<8x384xf32>
    %9 = arith.mulf %8, %5 : vector<8x384xf32>
    %10 = arith.select %7, %5, %9 : vector<8x384xi1>, vector<8x384xf32>
    %c0_7 = arith.constant 0 : index
    %c0_8 = arith.constant 0 : index
    %11 = vector.load %arg4[%c0_7, %c0_8] : memref<384x192xf32, #tpu.memory_space<vmem>>, vector<384x192xf32>
    %cst_9 = arith.constant dense<0.000000e+00> : vector<8x192xf32>
    %12 = tpu.matmul %10, %11, %cst_9 {dimension_numbers = #tpu.dot_dimension_numbers<[1], [0], [0], [1], [0, 0, 1, 1], [], []>} : vector<8x384xf32>, vector<384x192xf32>, vector<8x192xf32> -> vector<8x192xf32>
    %c0_10 = arith.constant 0 : index
    %c0_11 = arith.constant 0 : index
    %13 = vector.load %arg5[%c0_10, %c0_11] : memref<1x192xf32, #tpu.memory_space<vmem>>, vector<1x192xf32>
    %14 = vector.broadcast %13 : vector<1x192xf32> to vector<8x192xf32>
    %15 = arith.addf %12, %14 : vector<8x192xf32>
    %cst_12 = arith.constant 0.000000e+00 : f32
    %16 = vector.broadcast %cst_12 : f32 to vector<8x192xf32>
    %17 = arith.cmpf oge, %15, %16 : vector<8x192xf32>
    %cst_13 = arith.constant 2.000000e-01 : f32
    %18 = vector.broadcast %cst_13 : f32 to vector<8x192xf32>
    %19 = arith.mulf %18, %15 : vector<8x192xf32>
    %20 = arith.select %17, %15, %19 : vector<8x192xi1>, vector<8x192xf32>
    %c0_14 = arith.constant 0 : index
    %c0_15 = arith.constant 0 : index
    %21 = vector.load %arg6[%c0_14, %c0_15] : memref<192x64xf32, #tpu.memory_space<vmem>>, vector<192x64xf32>
    %cst_16 = arith.constant dense<0.000000e+00> : vector<8x64xf32>
    %22 = tpu.matmul %20, %21, %cst_16 {dimension_numbers = #tpu.dot_dimension_numbers<[1], [0], [0], [1], [0, 0, 1, 1], [], []>} : vector<8x192xf32>, vector<192x64xf32>, vector<8x64xf32> -> vector<8x64xf32>
    %c0_17 = arith.constant 0 : index
    %c0_18 = arith.constant 0 : index
    %23 = vector.load %arg7[%c0_17, %c0_18] : memref<1x64xf32, #tpu.memory_space<vmem>>, vector<1x64xf32>
    %24 = vector.broadcast %23 : vector<1x64xf32> to vector<8x64xf32>
    %25 = arith.addf %22, %24 : vector<8x64xf32>
    %cst_19 = arith.constant 0.000000e+00 : f32
    %26 = vector.broadcast %cst_19 : f32 to vector<8x64xf32>
    %27 = arith.cmpf oge, %25, %26 : vector<8x64xf32>
    %cst_20 = arith.constant 2.000000e-01 : f32
    %28 = vector.broadcast %cst_20 : f32 to vector<8x64xf32>
    %29 = arith.mulf %28, %25 : vector<8x64xf32>
    %30 = arith.select %27, %25, %29 : vector<8x64xi1>, vector<8x64xf32>
    %c0_21 = arith.constant 0 : index
    %c0_22 = arith.constant 0 : index
    %31 = vector.load %arg8[%c0_21, %c0_22] : memref<64x128xf32, #tpu.memory_space<vmem>>, vector<64x128xf32>
    %cst_23 = arith.constant dense<0.000000e+00> : vector<8x128xf32>
    %32 = tpu.matmul %30, %31, %cst_23 {dimension_numbers = #tpu.dot_dimension_numbers<[1], [0], [0], [1], [0, 0, 1, 1], [], []>} : vector<8x64xf32>, vector<64x128xf32>, vector<8x128xf32> -> vector<8x128xf32>
    %c0_24 = arith.constant 0 : index
    %c0_25 = arith.constant 0 : index
    %33 = vector.load %arg9[%c0_24, %c0_25] : memref<1x128xf32, #tpu.memory_space<vmem>>, vector<1x128xf32>
    %34 = vector.broadcast %33 : vector<1x128xf32> to vector<8x128xf32>
    %35 = arith.addf %32, %34 : vector<8x128xf32>
    %cst_26 = arith.constant 0.000000e+00 : f32
    %36 = vector.broadcast %cst_26 : f32 to vector<8x128xf32>
    %37 = arith.cmpf oge, %35, %36 : vector<8x128xf32>
    %cst_27 = arith.constant 2.000000e-01 : f32
    %38 = vector.broadcast %cst_27 : f32 to vector<8x128xf32>
    %39 = arith.mulf %38, %35 : vector<8x128xf32>
    %40 = arith.select %37, %35, %39 : vector<8x128xi1>, vector<8x128xf32>
    %c0_28 = arith.constant 0 : index
    %c0_29 = arith.constant 0 : index
    %41 = vector.load %arg10[%c0_28, %c0_29] : memref<8x128xf32, #tpu.memory_space<vmem>>, vector<8x128xf32>
    tpu.vector_store %arg10[%c0_28, %c0_29], %40 {strides = array<i32>} : memref<8x128xf32, #tpu.memory_space<vmem>>, vector<8x128xf32>,
    return
  }
  func.func @transform_0(%arg0: i32) -> (i32, i32) {
    %c0_i32 = arith.constant 0 : i32
    %c0_i32_0 = arith.constant 0 : i32
    return %arg0, %c0_i32 : i32, i32
  }
  func.func @transform_1(%arg0: i32) -> (i32, i32) {
    %c0_i32 = arith.constant 0 : i32
    %c0_i32_0 = arith.constant 0 : i32
    %c0_i32_1 = arith.constant 0 : i32
    return %c0_i32, %c0_i32_0 : i32, i32
  }
  func.func @transform_2(%arg0: i32) -> (i32, i32) {
    %c0_i32 = arith.constant 0 : i32
    %c0_i32_0 = arith.constant 0 : i32
    %c0_i32_1 = arith.constant 0 : i32
    return %c0_i32, %c0_i32_0 : i32, i32
  }
  func.func @transform_3(%arg0: i32) -> (i32, i32) {
    %c0_i32 = arith.constant 0 : i32
    %c0_i32_0 = arith.constant 0 : i32
    %c0_i32_1 = arith.constant 0 : i32
    return %c0_i32, %c0_i32_0 : i32, i32
  }
  func.func @transform_4(%arg0: i32) -> (i32, i32) {
    %c0_i32 = arith.constant 0 : i32
    %c0_i32_0 = arith.constant 0 : i32
    %c0_i32_1 = arith.constant 0 : i32
    return %c0_i32, %c0_i32_0 : i32, i32
  }
  func.func @transform_5(%arg0: i32) -> (i32, i32) {
    %c0_i32 = arith.constant 0 : i32
    %c0_i32_0 = arith.constant 0 : i32
    %c0_i32_1 = arith.constant 0 : i32
    return %c0_i32, %c0_i32_0 : i32, i32
  }
  func.func @transform_6(%arg0: i32) -> (i32, i32) {
    %c0_i32 = arith.constant 0 : i32
    %c0_i32_0 = arith.constant 0 : i32
    %c0_i32_1 = arith.constant 0 : i32
    return %c0_i32, %c0_i32_0 : i32, i32
  }
  func.func @transform_7(%arg0: i32) -> (i32, i32) {
    %c0_i32 = arith.constant 0 : i32
    %c0_i32_0 = arith.constant 0 : i32
    %c0_i32_1 = arith.constant 0 : i32
    return %c0_i32, %c0_i32_0 : i32, i32
  }
  func.func @transform_8(%arg0: i32) -> (i32, i32) {
    %c0_i32 = arith.constant 0 : i32
    %c0_i32_0 = arith.constant 0 : i32
    %c0_i32_1 = arith.constant 0 : i32
    return %c0_i32, %c0_i32_0 : i32, i32
  }
  func.func @transform_9(%arg0: i32) -> (i32, i32) {
    %c0_i32 = arith.constant 0 : i32
    %c0_i32_0 = arith.constant 0 : i32
    return %arg0, %c0_i32 : i32, i32
  }
}

</mosaic_0001>

<bundles_post_ra>
// kernel: fused_forward.1
= control target key start
LH: loop header
LB: loop body
LE: loop exit
PB: predicated region body
PF: predicated region fallthrough
CT: control target
= control target key end

     0   :  { %v999_v3 = vmov 0.0   ;;  %v1000_v4 = vmov 0.0|0.0   ;;  %vm1001_vm0 = vmmov 0   ;;  %vm535_vm6 = vcmask 523264   ;;  %s1648_s1 = inlined_call_operand.vmem [shape: f32[128,384], index: 1, kind: input, shape index: {}]   ;;  %s1649_s3 = inlined_call_operand.vmem [shape: f32[384,192], index: 3, kind: input, shape index: {}]   ;;  %s1650_s0 = inlined_call_operand.vmem [shape: f32[8,128], index: 0, kind: input, shape index: {}]   ;;  %s1651_s5 = inlined_call_operand.vmem [shape: f32[192,64], index: 5, kind: input, shape index: {}]   ;;  %s1652_s2 = inlined_call_operand.vmem [shape: f32[1,384], index: 2, kind: input, shape index: {}]   ;;  %s1653_s4 = inlined_call_operand.vmem [shape: f32[1,192], index: 4, kind: input, shape index: {}]   ;;  %s1654_s7 = inlined_call_operand.vmem [shape: f32[64,128], index: 7, kind: input, shape index: {}]   ;;  %s1655_s6 = inlined_call_operand.vmem [shape: f32[1,64], index: 6, kind: input, shape index: {}]   ;;  %s1656_s8 = inlined_call_operand.vmem [shape: f32[1,128], index: 8, kind: input, shape index: {}]   ;;  %s1657_s9 = inlined_call_operand.vmem [shape: f32[8,128], index: 9, kind: output, shape index: {}]  }
   0x1   :  { %v34_v0 = vld [vmem:[%s1648_s1 + $0x8] sm:$0xff]  ;;  %v37_v1 = vld [vmem:[%s1648_s1 + $0x20] sm:$0xff]  ;;  %162 = vmatprep.mubr.f32.mxu0 %v999_v3  ;;  %824 = vmatprep.subr.bf16.mxu1 %v1000_v4  ;;  %v36_v6 = vld [vmem:[%s1648_s1 + $0x18] sm:$0xff] }
   0x2   :  { %v33_v2 = vld [vmem:[%s1648_s1] sm:$0xff]  ;;  %v792_v5 = vpack.c.bf16 %v37_v1, %v34_v0  ;;  %v40_v7 = vld [vmem:[%s1648_s1 + $0x38] sm:$0xff]  ;;  %v43_v8 = vld [vmem:[%s1648_s1 + $0x50] sm:$0xff]  ;;  %770 = vmatprep.mubr.msk.f32.mxu1 %vm1001_vm0, %v999_v3 }
   0x3   :  { %v794_v9 = vpack.c.bf16 %v36_v6, %v33_v2  ;;  %v796_v10 = vpack.c.bf16 %v43_v8, %v40_v7  ;;  %v39_v11 = vld [vmem:[%s1648_s1 + $0x30] sm:$0xff]  ;;  %v42_v12 = vld [vmem:[%s1648_s1 + $0x48] sm:$0xff]  ;;  %v49_v14 = vld [vmem:[%s1648_s1 + $0x80] sm:$0xff] }
   0x4   :  { %v46_v13 = vld [vmem:[%s1648_s1 + $0x68] sm:$0xff]  ;;  %793 = vmatprep.subr.bf16.mxu0 %v792_v5  ;;  %v798_v15 = vpack.c.bf16 %v42_v12, %v39_v11  ;;  %v45_v17 = vld [vmem:[%s1648_s1 + $0x60] sm:$0xff]  ;;  %v48_v18 = vld [vmem:[%s1648_s1 + $0x78] sm:$0xff] }
   0x5   :  { %795 = vmatpush1.bf16.msra.mxu0 %v794_v9  ;;  %v800_v16 = vpack.c.bf16 %v49_v14, %v46_v13  ;;  %v52_v19 = vld [vmem:[%s1648_s1 + $0x98] sm:$0xff]  ;;  %v55_v20 = vld [vmem:[%s1648_s1 + $0xb0] sm:$0xff]  ;;  %v802_v21 = vpack.c.bf16 %v48_v18, %v45_v17  ;;  %v54_v24 = vld [vmem:[%s1648_s1 + $0xa8] sm:$0xff] }
   0x6   :  { %797 = vmatprep.subr.bf16.mxu0 %v796_v10  ;;  %v804_v22 = vpack.c.bf16 %v55_v20, %v52_v19  ;;  %v51_v23 = vld [vmem:[%s1648_s1 + $0x90] sm:$0xff]  ;;  %v58_v25 = vld [vmem:[%s1648_s1 + $0xc8] sm:$0xff]  ;;  %v61_v26 = vld [vmem:[%s1648_s1 + $0xe0] sm:$0xff] }
   0x7   :  { %v35_v27 = vld [vmem:[%s1648_s1 + $0x10] sm:$0xff]  ;;  %v38_v28 = vld [vmem:[%s1648_s1 + $0x28] sm:$0xff]  ;;  %v41_v29 = vld [vmem:[%s1648_s1 + $0x40] sm:$0xff]  ;;  %v806_v30 = vpack.c.bf16 %v54_v24, %v51_v23  ;;  %v808_v33 = vpack.c.bf16 %v61_v26, %v58_v25 }
   0x8   :  { %v825_v31 = vpack.c.bf16 %v38_v28, %v35_v27  ;;  %v44_v32 = vld [vmem:[%s1648_s1 + $0x58] sm:$0xff]  ;;  %v57_v34 = vld [vmem:[%s1648_s1 + $0xc0] sm:$0xff]  ;;  %v67_v37 = vld [vmem:[%s1648_s1 + $0x110] sm:$0xff] }
   0x9   :  { %799 = vmatpush1.bf16.msra.mxu0 %v798_v15  ;;  %v60_v35 = vld [vmem:[%s1648_s1 + $0xd8] sm:$0xff]  ;;  %v828_v38 = vpack.c.bf16 %v44_v32, %v41_v29  ;;  %v47_v39 = vld [vmem:[%s1648_s1 + $0x70] sm:$0xff]  ;;  %v50_v40 = vld [vmem:[%s1648_s1 + $0x88] sm:$0xff] }
   0xa   :  { %801 = vmatprep.subr.bf16.mxu0 %v800_v16  ;;  %v64_v36 = vld [vmem:[%s1648_s1 + $0xf8] sm:$0xff]  ;;  %826 = vmatpush3.bf16.msra.mxu1 %v825_v31  ;;  %v810_v41 = vpack.c.bf16 %v60_v35, %v57_v34  ;;  %v63_v43 = vld [vmem:[%s1648_s1 + $0xf0] sm:$0xff]  ;;  %v66_v44 = vld [vmem:[%s1648_s1 + $0x108] sm:$0xff]  ;;  %v831_v47 = vpack.c.bf16 %v50_v40, %v47_v39 }
   0xb   :  { %827 = vmatprep.subr.bf16.mxu1 %v1000_v4  ;;  %v812_v42 = vpack.c.bf16 %v67_v37, %v64_v36  ;;  %v70_v45 = vld [vmem:[%s1648_s1 + $0x128] sm:$0xff]  ;;  %v73_v46 = vld [vmem:[%s1648_s1 + $0x140] sm:$0xff]  ;;  %v56_v49 = vld [vmem:[%s1648_s1 + $0xb8] sm:$0xff]  ;;  %v814_v50 = vpack.c.bf16 %v66_v44, %v63_v43 }
   0xc   :  { %v53_v48 = vld [vmem:[%s1648_s1 + $0xa0] sm:$0xff]  ;;  %v816_v51 = vpack.c.bf16 %v73_v46, %v70_v45  ;;  %v72_v53 = vld [vmem:[%s1648_s1 + $0x138] sm:$0xff]  ;;  %v79_v55 = vld [vmem:[%s1648_s1 + $0x170] sm:$0xff] }
   0xd   :  { %803 = vmatpush1.bf16.msra.mxu0 %v802_v21  ;;  %v69_v52 = vld [vmem:[%s1648_s1 + $0x120] sm:$0xff]  ;;  %v76_v54 = vld [vmem:[%s1648_s1 + $0x158] sm:$0xff]  ;;  %v834_v56 = vpack.c.bf16 %v56_v49, %v53_v48  ;;  %v59_v57 = vld [vmem:[%s1648_s1 + $0xd0] sm:$0xff] }
   0xe   :  { %805 = vmatprep.subr.bf16.mxu0 %v804_v22  ;;  %829 = vmatpush3.bf16.msra.mxu1 %v828_v38  ;;  %v62_v58 = vld [vmem:[%s1648_s1 + $0xe8] sm:$0xff]  ;;  %v818_v59 = vpack.c.bf16 %v72_v53, %v69_v52  ;;  %v820_v60 = vpack.c.bf16 %v79_v55, %v76_v54  ;;  %v75_v61 = vld [vmem:[%s1648_s1 + $0x150] sm:$0xff]  ;;  %v251_v1 = vld [vmem:[%s1649_s3 + $0x18] sm:$0xff] }
   0xf   :  { %830 = vmatprep.subr.bf16.mxu1 %v1000_v4  ;;  %v78_v62 = vld [vmem:[%s1648_s1 + $0x168] sm:$0xff]  ;;  %v837_v63 = vpack.c.bf16 %v62_v58, %v59_v57  ;;  %v65_v2 = vld [vmem:[%s1648_s1 + $0x100] sm:$0xff]  ;;  %v68_v5 = vld [vmem:[%s1648_s1 + $0x118] sm:$0xff] }
  0x10   :  { %v249_v0 = vld [vmem:[%s1649_s3 + $0x8] sm:$0xff]  ;;  %v822_v6 = vpack.c.bf16 %v78_v62, %v75_v61  ;;  %v248_v8 = vld [vmem:[%s1649_s3] sm:$0xff]  ;;  %v250_v9 = vld [vmem:[%s1649_s3 + $0x10] sm:$0xff]  ;;  %v840_v10 = vpack.c.bf16 %v68_v5, %v65_v2 }
  0x11   :  { %807 = vmatpush1.bf16.msra.mxu0 %v806_v30  ;;  %v848_v7 = vpack.c.bf16 %v251_v1, %v249_v0  ;;  %v253_v11 = vld [vmem:[%s1649_s3 + $0x28] sm:$0xff]  ;;  %v255_v12 = vld [vmem:[%s1649_s3 + $0x38] sm:$0xff]  ;;  %v71_v13 = vld [vmem:[%s1648_s1 + $0x130] sm:$0xff]  ;;  %v850_v16 = vpack.c.bf16 %v250_v9, %v248_v8 }
  0x12   :  { %809 = vmatprep.subr.bf16.mxu0 %v808_v33  ;;  %832 = vmatpush3.bf16.msra.mxu1 %v831_v47  ;;  %v74_v14 = vld [vmem:[%s1648_s1 + $0x148] sm:$0xff]  ;;  %v32_v15 = vld [vmem:[%s1650_s0] sm:$0xff]  ;;  %v852_v17 = vpack.c.bf16 %v255_v12, %v253_v11  ;;  %v254_v19 = vld [vmem:[%s1649_s3 + $0x30] sm:$0xff] }
  0x13   :  { %833 = vmatprep.subr.bf16.mxu1 %v1000_v4  ;;  %v252_v18 = vld [vmem:[%s1649_s3 + $0x20] sm:$0xff]  ;;  %v843_v20 = vpack.c.bf16 %v74_v14, %v71_v13  ;;  %v257_v21 = vld [vmem:[%s1649_s3 + $0x48] sm:$0xff]  ;;  %v259_v22 = vld [vmem:[%s1649_s3 + $0x58] sm:$0xff] }
  0x14   :  { %v77_v23 = vld [vmem:[%s1648_s1 + $0x160] sm:$0xff]  ;;  %v80_v24 = vld [vmem:[%s1648_s1 + $0x178] sm:$0xff]  ;;  %v854_v25 = vpack.c.bf16 %v254_v19, %v252_v18  ;;  %v856_v26 = vpack.c.bf16 %v259_v22, %v257_v21  ;;  %v258_v28 = vld [vmem:[%s1649_s3 + $0x50] sm:$0xff] }
  0x15   :  { %811 = vmatpush1.bf16.msra.mxu0 %v810_v41  ;;  %v256_v27 = vld [vmem:[%s1649_s3 + $0x40] sm:$0xff]  ;;  %v846_v29 = vpack.c.bf16 %v80_v24, %v77_v23  ;;  %v261_v30 = vld [vmem:[%s1649_s3 + $0x68] sm:$0xff]  ;;  %v263_v31 = vld [vmem:[%s1649_s3 + $0x78] sm:$0xff] }
  0x16   :  { %813 = vmatprep.subr.bf16.mxu0 %v812_v42  ;;  %835 = vmatpush3.bf16.msra.mxu1 %v834_v56  ;;  %v858_v32 = vpack.c.bf16 %v258_v28, %v256_v27  ;;  %v860_v33 = vpack.c.bf16 %v263_v31, %v261_v30  ;;  %v260_v34 = vld [vmem:[%s1649_s3 + $0x60] sm:$0xff]  ;;  %v262_v35 = vld [vmem:[%s1649_s3 + $0x70] sm:$0xff]  ;;  %v265_v36 = vld [vmem:[%s1649_s3 + $0x88] sm:$0xff] }
  0x17   :  { %836 = vmatprep.subr.bf16.mxu1 %v1000_v4  ;;  %v267_v37 = vld [vmem:[%s1649_s3 + $0x98] sm:$0xff]  ;;  %v862_v38 = vpack.c.bf16 %v262_v35, %v260_v34  ;;  %v264_v40 = vld [vmem:[%s1649_s3 + $0x80] sm:$0xff]  ;;  %v266_v41 = vld [vmem:[%s1649_s3 + $0x90] sm:$0xff] }
  0x18   :  { %v864_v39 = vpack.c.bf16 %v267_v37, %v265_v36  ;;  %v269_v42 = vld [vmem:[%s1649_s3 + $0xa8] sm:$0xff]  ;;  %v271_v43 = vld [vmem:[%s1649_s3 + $0xb8] sm:$0xff]  ;;  %v866_v44 = vpack.c.bf16 %v266_v41, %v264_v40  ;;  %v268_v46 = vld [vmem:[%s1649_s3 + $0xa0] sm:$0xff] }
  0x19   :  { %815 = vmatpush1.bf16.msra.mxu0 %v814_v50  ;;  %v868_v45 = vpack.c.bf16 %v271_v43, %v269_v42  ;;  %v270_v47 = vld [vmem:[%s1649_s3 + $0xb0] sm:$0xff]  ;;  %v273_v48 = vld [vmem:[%s1649_s3 + $0xc8] sm:$0xff]  ;;  %v275_v49 = vld [vmem:[%s1649_s3 + $0xd8] sm:$0xff] }
  0x1a   :  { %817 = vmatprep.subr.bf16.mxu0 %v816_v51  ;;  %838 = vmatpush3.bf16.msra.mxu1 %v837_v63  ;;  %v870_v50 = vpack.c.bf16 %v270_v47, %v268_v46  ;;  %v872_v51 = vpack.c.bf16 %v275_v49, %v273_v48  ;;  %v272_v52 = vld [vmem:[%s1649_s3 + $0xc0] sm:$0xff]  ;;  %v274_v53 = vld [vmem:[%s1649_s3 + $0xd0] sm:$0xff]  ;;  %v277_v54 = vld [vmem:[%s1649_s3 + $0xe8] sm:$0xff] }
  0x1b   :  { %839 = vmatprep.subr.bf16.mxu1 %v1000_v4  ;;  %v279_v55 = vld [vmem:[%s1649_s3 + $0xf8] sm:$0xff]  ;;  %v874_v56 = vpack.c.bf16 %v274_v53, %v272_v52  ;;  %v276_v58 = vld [vmem:[%s1649_s3 + $0xe0] sm:$0xff]  ;;  %v282_v1 = vld [vmem:[%s1649_s3 + $0x110] sm:$0xff] }
  0x1c   :  { %v876_v57 = vpack.c.bf16 %v279_v55, %v277_v54  ;;  %v283_v61 = vld [vmem:[%s1649_s3 + $0x118] sm:$0xff]  ;;  %v280_v0 = vld [vmem:[%s1649_s3 + $0x100] sm:$0xff]  ;;  %v285_v2 = vld [vmem:[%s1649_s3 + $0x128] sm:$0xff] }
  0x1d   :  { %819 = vmatpush1.bf16.msra.mxu0 %v818_v59  ;;  %v278_v59 = vld [vmem:[%s1649_s3 + $0xf0] sm:$0xff]  ;;  %v287_v5 = vld [vmem:[%s1649_s3 + $0x138] sm:$0xff]  ;;  %v284_v8 = vld [vmem:[%s1649_s3 + $0x120] sm:$0xff] }
  0x1e   :  { %821 = vmatprep.subr.bf16.mxu0 %v820_v60  ;;  %841 = vmatpush3.bf16.msra.mxu1 %v840_v10  ;;  %v281_v60 = vld [vmem:[%s1649_s3 + $0x108] sm:$0xff]  ;;  %v878_v62 = vpack.c.bf16 %v278_v59, %v276_v58  ;;  %v286_v9 = vld [vmem:[%s1649_s3 + $0x130] sm:$0xff]  ;;  %v291_v11 = vld [vmem:[%s1649_s3 + $0x158] sm:$0xff] }
  0x1f   :  { %842 = vmatprep.subr.bf16.mxu1 %v1000_v4  ;;  %v880_v63 = vpack.c.bf16 %v283_v61, %v281_v60  ;;  %v289_v10 = vld [vmem:[%s1649_s3 + $0x148] sm:$0xff]  ;;  %v886_v12 = vpack.c.bf16 %v286_v9, %v284_v8  ;;  %v288_v14 = vld [vmem:[%s1649_s3 + $0x140] sm:$0xff]  ;;  %v294_v21 = vld [vmem:[%s1649_s3 + $0x170] sm:$0xff] }
  0x20   :  { %v888_v13 = vpack.c.bf16 %v291_v11, %v289_v10  ;;  %v297_v22 = vld [vmem:[%s1649_s3 + $0x188] sm:$0xff]  ;;  %v299_v23 = vld [vmem:[%s1649_s3 + $0x198] sm:$0xff]  ;;  %v298_v27 = vld [vmem:[%s1649_s3 + $0x190] sm:$0xff] }
  0x21   :  { %823 = vmatpush1.bf16.msra.mxu0 %v822_v6  ;;  %v882_v6 = vpack.c.bf16 %v282_v1, %v280_v0  ;;  %v301_v28 = vld [vmem:[%s1649_s3 + $0x1a8] sm:$0xff]  ;;  %v307_v35 = vld [vmem:[%s1649_s3 + $0x1d8] sm:$0xff]  ;;  %v506_v52 = vld [vmem:[%s1651_s5 + $0x10] sm:$0xff] }
  0x22   :  { %849 = vmatprep.subr.bf16.mxu0 %v848_v7  ;;  %844 = vmatpush3.bf16.msra.mxu1 %v843_v20  ;;  %v884_v7 = vpack.c.bf16 %v287_v5, %v285_v2  ;;  %v292_v20 = vld [vmem:[%s1649_s3 + $0x160] sm:$0xff]  ;;  %v305_v34 = vld [vmem:[%s1649_s3 + $0x1c8] sm:$0xff]  ;;  %v311_v42 = vld [vmem:[%s1649_s3 + $0x1f8] sm:$0xff] }
  0x23   :  { %845 = vmatprep.subr.bf16.mxu1 %v1000_v4  ;;  %v894_v24 = vpack.c.bf16 %v294_v21, %v292_v20  ;;  %v904_v37 = vpack.c.bf16 %v307_v35, %v305_v34  ;;  %v309_v41 = vld [vmem:[%s1649_s3 + $0x1e8] sm:$0xff]  ;;  %v315_v48 = vld [vmem:[%s1649_s3 + $0x218] sm:$0xff]  ;;  %v510_v59 = vld [vmem:[%s1651_s5 + $0x30] sm:$0xff] }
  0x24   :  { %163 = vmatmul.mubr.f32.vlgmr.msra.gmra.mrb[0].mxu0 %v32_v15  ;;  %v908_v43 = vpack.c.bf16 %v311_v42, %v309_v41  ;;  %v313_v47 = vld [vmem:[%s1649_s3 + $0x208] sm:$0xff]  ;;  %v507_v54 = vld [vmem:[%s1651_s5 + $0x18] sm:$0xff]  ;;  %v514_v1 = vld [vmem:[%s1651_s5 + $0x50] sm:$0xff] }
  0x25   :  { %851 = vmatpush1.bf16.msra.mxu0 %v850_v16  ;;  %v293_v16 = vld [vmem:[%s1649_s3 + $0x168] sm:$0xff]  ;;  %v912_v49 = vpack.c.bf16 %v315_v48, %v313_v47  ;;  %v948_v55 = vpack.c.bf16 %v507_v54, %v506_v52  ;;  %v511_v60 = vld [vmem:[%s1651_s5 + $0x38] sm:$0xff]  ;;  %v518_v9 = vld [vmem:[%s1651_s5 + $0x70] sm:$0xff] }
  0x26   :  { %853 = vmatprep.subr.bf16.mxu0 %v852_v17  ;;  %847 = vmatpush3.bf16.msra.mxu1 %v846_v29  ;;  %v295_v17 = vld [vmem:[%s1649_s3 + $0x178] sm:$0xff]  ;;  %v954_v61 = vpack.c.bf16 %v511_v60, %v510_v59  ;;  %v1485_v21 = vld [vmem:[%s1652_s2] sm:$0x7]  ;;  %v321_v41 = vld [vmem:[%s1649_s3 + $0x248] sm:$0xff] }
  0x27   :  { %944 = vmatprep.subr.bf16.mxu1 %v1000_v4  ;;  %v892_v19 = vpack.c.bf16 %v295_v17, %v293_v16  ;;  %v303_v29 = vld [vmem:[%s1649_s3 + $0x1b8] sm:$0xff]  ;;  %v325_v48 = vld [vmem:[%s1649_s3 + $0x268] sm:$0xff]  ;;  %v326_v54 = vld [vmem:[%s1649_s3 + $0x270] sm:$0xff] }
  0x28   :  { %v900_v31 = vpack.c.bf16 %v303_v29, %v301_v28  ;;  %v515_v2 = vld [vmem:[%s1651_s5 + $0x58] sm:$0xff]  ;;  %v312_v29 = vld [vmem:[%s1649_s3 + $0x200] sm:$0xff]  ;;  %v330_v60 = vld [vmem:[%s1649_s3 + $0x290] sm:$0xff] }
  0x29   :  { %855 = vmatpush1.bf16.msra.mxu0 %v854_v25  ;;  %771 = vmatmul.mubr.f32.vlgmr.msra.gmra.mrb[0].mxu1 %v32_v15  ;;  %v290_v15 = vld [vmem:[%s1649_s3 + $0x150] sm:$0xff]  ;;  %v896_v25 = vpack.c.bf16 %v299_v23, %v297_v22  ;;  %v960_v5 = vpack.c.bf16 %v515_v2, %v514_v1  ;;  %v519_v10 = vld [vmem:[%s1651_s5 + $0x78] sm:$0xff]  ;;  %v328_v59 = vld [vmem:[%s1649_s3 + $0x280] sm:$0xff] }
  0x2a   :  { %857 = vmatprep.subr.bf16.mxu0 %v856_v26  ;;  %v890_v18 = vpack.c.bf16 %v290_v15, %v288_v14  ;;  %v296_v26 = vld [vmem:[%s1649_s3 + $0x180] sm:$0xff]  ;;  %v966_v11 = vpack.c.bf16 %v519_v10, %v518_v9  ;;  %v522_v15 = vld [vmem:[%s1651_s5 + $0x90] sm:$0xff]  ;;  %v523_v16 = vld [vmem:[%s1651_s5 + $0x98] sm:$0xff] }
  0x2b   :  { %v898_v30 = vpack.c.bf16 %v298_v27, %v296_v26  ;;  %v972_v17 = vpack.c.bf16 %v523_v16, %v522_v15  ;;  %v323_v42 = vld [vmem:[%s1649_s3 + $0x258] sm:$0xff]  ;;  %v332_v1 = vld [vmem:[%s1649_s3 + $0x2a0] sm:$0xff]  ;;  %v334_v2 = vld [vmem:[%s1649_s3 + $0x2b0] sm:$0xff] }
  0x2c   :  { %v336_v10 = vld [vmem:[%s1649_s3 + $0x2c0] sm:$0xff] }
  0x2d   :  { %859 = vmatpush1.bf16.msra.mxu0 %v858_v32  ;;  %v300_v32 = vld [vmem:[%s1649_s3 + $0x1a0] sm:$0xff] }
  0x2e   :  { %861 = vmatprep.subr.bf16.mxu0 %v860_v33  ;;  %v302_v33 = vld [vmem:[%s1649_s3 + $0x1b0] sm:$0xff] }
  0x2f   :  { %v902_v36 = vpack.c.bf16 %v302_v33, %v300_v32  ;;  %v317_v32 = vld [vmem:[%s1649_s3 + $0x228] sm:$0xff]  ;;  %v319_v33 = vld [vmem:[%s1649_s3 + $0x238] sm:$0xff] }
  0x31   :  { %863 = vmatpush1.bf16.msra.mxu0 %v862_v38  ;;  %v304_v38 = vld [vmem:[%s1649_s3 + $0x1c0] sm:$0xff] }
  0x32   :  { %865 = vmatprep.subr.bf16.mxu0 %v864_v39  ;;  %v306_v39 = vld [vmem:[%s1649_s3 + $0x1d0] sm:$0xff] }
  0x33   :  { %v906_v40 = vpack.c.bf16 %v306_v39, %v304_v38  ;;  %v316_v38 = vld [vmem:[%s1649_s3 + $0x220] sm:$0xff]  ;;  %v318_v39 = vld [vmem:[%s1649_s3 + $0x230] sm:$0xff] }
  0x35   :  { %867 = vmatpush1.bf16.msra.mxu0 %v866_v44  ;;  %v308_v44 = vld [vmem:[%s1649_s3 + $0x1e0] sm:$0xff] }
  0x36   :  { %869 = vmatprep.subr.bf16.mxu0 %v868_v45  ;;  %v310_v45 = vld [vmem:[%s1649_s3 + $0x1f0] sm:$0xff] }
  0x37   :  { %v910_v46 = vpack.c.bf16 %v310_v45, %v308_v44  ;;  %v920_v44 = vpack.c.bf16 %v323_v42, %v321_v41  ;;  %v320_v45 = vld [vmem:[%s1649_s3 + $0x240] sm:$0xff] }
  0x39   :  { %871 = vmatpush1.bf16.msra.mxu0 %v870_v50  ;;  %v504_v50 = vld [vmem:[%s1651_s5] sm:$0xff] }
  0x3a   :  { %873 = vmatprep.subr.bf16.mxu0 %v872_v51  ;;  %v505_v51 = vld [vmem:[%s1651_s5 + $0x8] sm:$0xff] }
  0x3b   :  { %v945_v53 = vpack.c.bf16 %v505_v51, %v504_v50 }
  0x3d   :  { %875 = vmatpush1.bf16.msra.mxu0 %v874_v56  ;;  %946 = vmatpush1.bf16.msra.mxu1 %v945_v53  ;;  %v508_v56 = vld [vmem:[%s1651_s5 + $0x20] sm:$0xff] }
  0x3e   :  { %877 = vmatprep.subr.bf16.mxu0 %v876_v57  ;;  %947 = vmatprep.subr.bf16.mxu1 %v1000_v4  ;;  %v509_v57 = vld [vmem:[%s1651_s5 + $0x28] sm:$0xff]  ;;  %v324_v53 = vld [vmem:[%s1649_s3 + $0x260] sm:$0xff] }
  0x3f   :  { %v951_v58 = vpack.c.bf16 %v509_v57, %v508_v56  ;;  %v331_v56 = vld [vmem:[%s1649_s3 + $0x298] sm:$0xff]  ;;  %v926_v57 = vpack.c.bf16 %v326_v54, %v324_v53 }
  0x41   :  { %879 = vmatpush1.bf16.msra.mxu0 %v878_v62  ;;  %949 = vmatpush1.bf16.msra.mxu1 %v948_v55  ;;  %v512_v62 = vld [vmem:[%s1651_s5 + $0x40] sm:$0xff]  ;;  %v329_v55 = vld [vmem:[%s1649_s3 + $0x288] sm:$0xff] }
  0x42   :  { %881 = vmatprep.subr.bf16.mxu0 %v880_v63  ;;  %950 = vmatprep.subr.bf16.mxu1 %v1000_v4  ;;  %v513_v63 = vld [vmem:[%s1651_s5 + $0x48] sm:$0xff] }
  0x43   :  { %v957_v0 = vpack.c.bf16 %v513_v63, %v512_v62  ;;  %v335_v62 = vld [vmem:[%s1649_s3 + $0x2b8] sm:$0xff]  ;;  %v930_v63 = vpack.c.bf16 %v330_v60, %v328_v59 }
  0x45   :  { %883 = vmatpush1.bf16.msra.mxu0 %v882_v6  ;;  %952 = vmatpush1.bf16.msra.mxu1 %v951_v58  ;;  %v516_v6 = vld [vmem:[%s1651_s5 + $0x60] sm:$0xff]  ;;  %v928_v58 = vpack.c.bf16 %v331_v56, %v329_v55 }
  0x46   :  { %885 = vmatprep.subr.bf16.mxu0 %v884_v7  ;;  %953 = vmatprep.subr.bf16.mxu1 %v1000_v4  ;;  %v517_v7 = vld [vmem:[%s1651_s5 + $0x68] sm:$0xff]  ;;  %v710_v56 = vld [vmem:[%s1656_s8] ss:$0 sm:$0xff] }
  0x47   :  { %v963_v8 = vpack.c.bf16 %v517_v7, %v516_v6  ;;  %v337_v6 = vld [vmem:[%s1649_s3 + $0x2c8] sm:$0xff]  ;;  %v339_v7 = vld [vmem:[%s1649_s3 + $0x2d8] sm:$0xff] }
  0x48   :  { %v936_v9 = vpack.c.bf16 %v339_v7, %v337_v6 }
  0x49   :  { %887 = vmatpush1.bf16.msra.mxu0 %v886_v12  ;;  %955 = vmatpush1.bf16.msra.mxu1 %v954_v61  ;;  %v520_v12 = vld [vmem:[%s1651_s5 + $0x80] sm:$0xff]  ;;  %v333_v61 = vld [vmem:[%s1649_s3 + $0x2a8] sm:$0xff] }
  0x4a   :  { %889 = vmatprep.subr.bf16.mxu0 %v888_v13  ;;  %956 = vmatprep.subr.bf16.mxu1 %v1000_v4  ;;  %v521_v13 = vld [vmem:[%s1651_s5 + $0x88] sm:$0xff] }
  0x4b   :  { %v969_v14 = vpack.c.bf16 %v521_v13, %v520_v12  ;;  %v341_v13 = vld [vmem:[%s1649_s3 + $0x2e8] sm:$0xff] }
  0x4d   :  { %891 = vmatpush1.bf16.msra.mxu0 %v890_v18  ;;  %958 = vmatpush1.bf16.msra.mxu1 %v957_v0  ;;  %v83_v18 = vlaneseq  ;;  %v932_v0 = vpack.c.bf16 %v335_v62, %v333_v61 }
  0x4e   :  { %893 = vmatprep.subr.bf16.mxu0 %v892_v19  ;;  %959 = vmatprep.subr.bf16.mxu1 %v1000_v4 }
  0x4f   :  { %v1479_v19 = vshrl.u32 %v83_v18, 7  ;;  %v342_v18 = vld [vmem:[%s1649_s3 + $0x2f0] sm:$0xff] }
  0x51   :  { %895 = vmatpush1.bf16.msra.mxu0 %v894_v24  ;;  %961 = vmatpush1.bf16.msra.mxu1 %v960_v5  ;;  %v85_v20 = vsub.s32 0, %v1479_v19  ;;  %v89_v22 = vsub.s32 1, %v1479_v19  ;;  %v93_v5 = vsub.s32 2, %v1479_v19 }
  0x52   :  { %897 = vmatprep.subr.bf16.mxu0 %v896_v25  ;;  %962 = vmatprep.subr.bf16.mxu1 %v1000_v4 }
  0x53   :  { %v86_v23 = vrot.slane %v1485_v21, %v85_v20  ;;  %v90_v24 = vrot.slane %v1485_v21, %v89_v22  ;;  %v94_v12 = vrot.slane %v1485_v21, %v93_v5 }
  0x55   :  { %899 = vmatpush1.bf16.msra.mxu0 %v898_v30  ;;  %964 = vmatpush1.bf16.msra.mxu1 %v963_v8  ;;  %v314_v30 = vld [vmem:[%s1649_s3 + $0x210] sm:$0xff]  ;;  %v934_v8 = vpack.c.bf16 %v334_v2, %v332_v1 }
  0x56   :  { %901 = vmatprep.subr.bf16.mxu0 %v900_v31  ;;  %965 = vmatprep.subr.bf16.mxu1 %v1000_v4  ;;  %v914_v35 = vpack.c.bf16 %v314_v30, %v312_v29  ;;  %v526_v29 = vld [vmem:[%s1651_s5 + $0xb0] sm:$0xff]  ;;  %v527_v30 = vld [vmem:[%s1651_s5 + $0xb8] sm:$0xff] }
  0x59   :  { %903 = vmatpush1.bf16.msra.mxu0 %v902_v36  ;;  %967 = vmatpush1.bf16.msra.mxu1 %v966_v11  ;;  %v338_v11 = vld [vmem:[%s1649_s3 + $0x2d0] sm:$0xff] }
  0x5a   :  { %905 = vmatprep.subr.bf16.mxu0 %v904_v37  ;;  %968 = vmatprep.subr.bf16.mxu1 %v1000_v4  ;;  %v916_v37 = vpack.c.bf16 %v319_v33, %v317_v32  ;;  %v938_v15 = vpack.c.bf16 %v338_v11, %v336_v10  ;;  %v344_v32 = vld [vmem:[%s1653_s4] sm:$0x3] }
  0x5b   :  { %v349_v33 = vrot.slane %v344_v32, %v85_v20 }
  0x5d   :  { %907 = vmatpush1.bf16.msra.mxu0 %v906_v40  ;;  %970 = vmatpush1.bf16.msra.mxu1 %v969_v14  ;;  %v343_v14 = vld [vmem:[%s1649_s3 + $0x2f8] sm:$0xff] }
  0x5e   :  { %909 = vmatprep.subr.bf16.mxu0 %v908_v43  ;;  %971 = vmatprep.subr.bf16.mxu1 %v1000_v4  ;;  %v918_v43 = vpack.c.bf16 %v318_v39, %v316_v38  ;;  %v940_v16 = vpack.c.bf16 %v343_v14, %v341_v13  ;;  %v612_v39 = vld [vmem:[%s1654_s7] sm:$0xff] }
  0x61   :  { %911 = vmatpush1.bf16.msra.mxu0 %v910_v46  ;;  %973 = vmatpush1.bf16.msra.mxu1 %v972_v17  ;;  %v322_v46 = vld [vmem:[%s1649_s3 + $0x250] sm:$0xff]  ;;  %v340_v17 = vld [vmem:[%s1649_s3 + $0x2e0] sm:$0xff] }
  0x62   :  { %913 = vmatprep.subr.bf16.mxu0 %v912_v49  ;;  %974 = vmatprep.subr.bf16.mxu1 %v1000_v4  ;;  %v327_v49 = vld [vmem:[%s1649_s3 + $0x278] sm:$0xff]  ;;  %v922_v51 = vpack.c.bf16 %v322_v46, %v320_v45  ;;  %v616_v46 = vld [vmem:[%s1654_s7 + $0x20] sm:$0xff] }
  0x63   :  { %v924_v52 = vpack.c.bf16 %v327_v49, %v325_v48  ;;  %v619_v49 = vld [vmem:[%s1654_s7 + $0x38] sm:$0xff] }
  0xf7   :  { %v164_v25 = vpop.f32.mrb[0].mxu0 }
  0xf8   :  { %v165_v26 = vadd.f32 %v164_v25, %v86_v23  ;;  %v166_v27 = vpop.f32.mrb[1].mxu0  ;;  %v942_v23 = vpack.c.bf16 %v342_v18, %v340_v17 }
  0xf9   :  { %v167_v28 = vadd.f32 %v166_v27, %v90_v24  ;;  %v525_v27 = vld [vmem:[%s1651_s5 + $0xa8] sm:$0xff] }
  0xfa   :  { %v242_v31 = vmul.f32 0.2, %v165_v26  ;;  %vm239_vm1 = vcmp.ge.f32.partialorder %v165_v26, 0.0 }
  0xfb   :  { %v243_v34 = vmul.f32 0.2, %v167_v28  ;;  %vm240_vm2 = vcmp.ge.f32.partialorder %v167_v28, 0.0 }
  0xfc   :  { %v245_v40 = vsel %vm239_vm1, %v165_v26, %v242_v31  ;;  %v235_v47 = vpop.f32.mrb[0].mxu1  ;;  %v524_v26 = vld [vmem:[%s1651_s5 + $0xa0] sm:$0xff]  ;;  %v978_v31 = vpack.c.bf16 %v527_v30, %v526_v29 }
  0xfd   :  { %v246_v36 = vsel %vm240_vm2, %v167_v28, %v243_v34  ;;  %v772_v50 = vpop.f32.mrb[1].mxu1  ;;  %v236_v21 = vadd.f32 %v235_v47, %v94_v12  ;;  %v975_v28 = vpack.c.bf16 %v525_v27, %v524_v26  ;;  %v353_v34 = vrot.slane %v344_v32, %v89_v22  ;;  %v614_v22 = vld [vmem:[%s1654_s7 + $0x10] sm:$0xff]  ;;  %v617_v47 = vld [vmem:[%s1654_s7 + $0x28] sm:$0xff] }
  0xfe   :  { %420 = vmatprep.mubr.f32.mxu0 %v246_v36  ;;  %v987_v48 = vpack.c.bf16 %v617_v47, %v616_v46 }
  0xff   :  { %421 = vmatmul.mubr.f32.vlgmr.msra.gmra.mrb[2].mxu0 %v245_v40  ;;  %v244_v24 = vmul.f32 0.2, %v236_v21  ;;  %vm241_vm3 = vcmp.ge.f32.partialorder %v236_v21, 0.0  ;;  %976 = vmatpush1.bf16.msra.mxu1 %v975_v28  ;;  %v613_v40 = vld [vmem:[%s1654_s7 + $0x8] sm:$0xff] }
 0x100   :  { %915 = vmatpush1.bf16.msra.mxu0 %v914_v35  ;;  %491 = vmatprep.mubr.f32.mxu0 %v999_v3  ;;  %v981_v20 = vpack.c.bf16 %v613_v40, %v612_v39 }
 0x101   :  { %917 = vmatprep.subr.bf16.mxu0 %v916_v37  ;;  %v247_v25 = vsel %vm241_vm3, %v236_v21, %v244_v24  ;;  %977 = vmatprep.subr.bf16.mxu1 %v1000_v4 }
 0x103   :  { %979 = vmatpush1.bf16.msra.mxu1 %v978_v31 }
 0x104   :  { %919 = vmatpush1.bf16.msra.mxu0 %v918_v43  ;;  %980 = vmatprep.subr.bf16.mxu1 %v1000_v4  ;;  %v615_v43 = vld [vmem:[%s1654_s7 + $0x18] sm:$0xff] }
 0x105   :  { %921 = vmatprep.subr.bf16.mxu0 %v920_v44  ;;  %v984_v45 = vpack.c.bf16 %v615_v43, %v614_v22 }
 0x108   :  { %923 = vmatpush1.bf16.msra.mxu0 %v922_v51  ;;  %v708_v51 = vld [vmem:[%s1655_s6] ss:$0 sm:$0xff] }
 0x109   :  { %925 = vmatprep.subr.bf16.mxu0 %v924_v52 }
 0x10c   :  { %927 = vmatpush1.bf16.msra.mxu0 %v926_v57 }
 0x10d   :  { %929 = vmatprep.subr.bf16.mxu0 %v928_v58 }
 0x110   :  { %931 = vmatpush1.bf16.msra.mxu0 %v930_v63 }
 0x111   :  { %933 = vmatprep.subr.bf16.mxu0 %v932_v0 }
 0x114   :  { %935 = vmatpush1.bf16.msra.mxu0 %v934_v8 }
 0x115   :  { %937 = vmatprep.subr.bf16.mxu0 %v936_v9 }
 0x118   :  { %939 = vmatpush1.bf16.msra.mxu0 %v938_v15 }
 0x119   :  { %941 = vmatprep.subr.bf16.mxu0 %v940_v16 }
 0x11c   :  { %943 = vmatpush1.bf16.msra.mxu0 %v942_v23 }
 0x11f   :  { %492 = vmatmul.mubr.f32.vlgmr.msra.gmra.mrb[2].mxu0 %v247_v25 }
 0x1f2   :  { %v493_v35 = vpop.f32.mrb[2].mxu0 }
 0x1f3   :  { %v992_v36 = vadd.f32 %v493_v35, %v349_v33  ;;  %v495_v37 = vpop.f32.mrb[3].mxu0 }
 0x1f4   :  { %v993_v38 = vadd.f32 %v495_v37, %v353_v34 }
 0x1f5   :  { %v500_v41 = vmul.f32 0.2, %v992_v36  ;;  %vm498_vm4 = vcmp.ge.f32.partialorder %v992_v36, 0.0 }
 0x1f6   :  { %vm499_vm5 = vcmp.ge.f32.partialorder %v993_v38, 0.0  ;;  %v501_v42 = vmul.f32 0.2, %v993_v38 }
 0x1f7   :  { %v502_v44 = vsel %vm498_vm4, %v992_v36, %v500_v41 }
 0x1f8   :  { %v503_v19 = vsel %vm499_vm5, %v993_v38, %v501_v42 }
 0x1f9   :  { %709 = vmatprep.mubr.msk.f32.mxu1 %vm535_vm6, %v503_v19 }
 0x1fa   :  { %604 = vmatmul.mubr.f32.vlgmr.msra.gmra.mrb[2].mxu1 %v502_v44 }
 0x1fb   :  { %982 = vmatpush3.bf16.msra.mxu1 %v981_v20  ;;  %789 = vmatprep.mubr.msk.f32.mxu1 %vm1001_vm0, %v999_v3  ;;  %v618_v3 = vld [vmem:[%s1654_s7 + $0x30] sm:$0xff] }
 0x1fc   :  { %983 = vmatprep.subr.bf16.mxu1 %v1000_v4  ;;  %v990_v50 = vpack.c.bf16 %v619_v49, %v618_v3 }
 0x1ff   :  { %985 = vmatpush3.bf16.msra.mxu1 %v984_v45 }
 0x200   :  { %986 = vmatprep.subr.bf16.mxu1 %v1000_v4 }
 0x203   :  { %988 = vmatpush3.bf16.msra.mxu1 %v987_v48 }
 0x204   :  { %989 = vmatprep.subr.bf16.mxu1 %v1000_v4 }
 0x207   :  { %991 = vmatpush3.bf16.msra.mxu1 %v990_v50 }
 0x2cd   :  { %v605_v52 = vpop.f32.mrb[2].mxu1 }
 0x2ce   :  { %v606_v53 = vadd.f32 %v708_v51, %v605_v52  ;;  %v607_v54 = vpop.f32.mrb[3].mxu1 }
 0x2d0   :  { %vm609_vm7 = vcmp.ge.f32.partialorder %v606_v53, 0.0  ;;  %v610_v55 = vmul.f32 0.2, %v606_v53 }
 0x2d2   :  { %v611_v4 = vsel %vm609_vm7, %v606_v53, %v610_v55 }
 0x2d3   :  { %790 = vmatmul.mubr.msk.f32.vlgmr.msra.gmra.mrb[4].mxu1 %vm535_vm6, %v611_v4 }
 0x3a6   :  { %v696_v57 = vpop.f32.mrb[4].mxu1 }
 0x3a7   :  { %v697_v58 = vadd.f32 %v710_v56, %v696_v57  ;;  %v791_v59 = vpop.f32.mrb[5].mxu1 }
 0x3a9   :  { %vm700_vm8 = vcmp.ge.f32.partialorder %v697_v58, 0.0  ;;  %v701_v60 = vmul.f32 0.2, %v697_v58 }
 0x3ab   :  { %v702_v61 = vsel %vm700_vm8, %v697_v58, %v701_v60 }
 0x3ac   :  { %703 = vst [vmem:[%s1657_s9] sm:$0xff] %v702_v61 }

</bundles_post_ra>
